<compile_context>
chip_gen: v6e
topology: v6e:2x2x1
jax: 0.10.0
libtpu: 0.0.40
codegen_flags: <defaults>
</compile_context>

<pallas_src>
import functools

import jax
import jax.numpy as jnp
from jax import lax
from jax.experimental import pallas as pl
from jax.experimental.pallas import tpu as pltpu

LANES = 128
CHUNK_ROWS = 64                 # rows per fused compute+reduce step (8 vregs/array, f32)
MAX_TILE_ROWS = 4096            # 4096x128 f32 block = 2 MiB; 2 inputs x 2 buffers = 8 MiB
VMEM_LIMIT = 32 * 1024 * 1024   # explicit scoped-VMEM budget (safe on v5e/v6e/v7x)


def _round_up(x, m):
    return ((x + m - 1) // m) * m


def _sublane_multiple(dtype):
    # f32 -> 8 rows, bf16 -> 16, int8/fp8 -> 32 (packed sublane tiling).
    itemsize = jnp.dtype(dtype).itemsize
    return max(8, 32 // itemsize)


def _num_tensorcores():
    # Only v7x exposes 2 TensorCores per device; v5e/v6e have 1.
    try:
        kind = jax.devices()[0].device_kind.lower()
    except Exception:
        return 1
    return 2 if ("v7" in kind or "7x" in kind) else 1


def _weighted_bce(x, t, pos, neg):
    """Exact eps-clamped weighted BCE of the PyTorch module (computed in f32).

    p = sigmoid(x); loss = -(pos*t*log(p+1e-8) + neg*(1-t)*log(1-p+1e-8)).
    sigmoid is evaluated via exp(-|x|) so it never overflows.
    """
    e = jnp.exp(-jnp.abs(x))
    p = jnp.where(x >= 0.0, 1.0, e) / (1.0 + e)
    return -(pos * t * jnp.log(p + 1e-8) + neg * (1.0 - t) * jnp.log(1.0 - p + 1e-8))


# --------------------------------------------------------------------------- #
# Kernels
# --------------------------------------------------------------------------- #
def _wbce_reduce_kernel(lg_ref, tg_ref, out_ref, *, pos, neg, nblocks,
                        blocks_per_core, tail_rows, tail_masked, has_dup):
    c = pl.program_id(0)            # core axis (CORE_PARALLEL on v7x, size-1 otherwise)
    i = pl.program_id(1)            # reduction axis: output block stays resident
    gblock = c * blocks_per_core + i

    @pl.when(i == 0)
    def _():
        out_ref[...] = jnp.zeros_like(out_ref)

    tile_rows = lg_ref.shape[0]
    n_chunks = tile_rows // CHUNK_ROWS

    def partial_sum(masked):
        # Fused compute + partial reduce over CHUNK_ROWS-row slices: the full
        # (tile_rows, 128) loss tensor is never materialized.
        def body(j, acc):
            r = pl.multiple_of(j * CHUNK_ROWS, CHUNK_ROWS)
            x = lg_ref[pl.ds(r, CHUNK_ROWS), :].astype(jnp.float32)
            t = tg_ref[pl.ds(r, CHUNK_ROWS), :].astype(jnp.float32)
            loss = _weighted_bce(x, t, pos, neg)
            if masked:
                # Keep the where-select (not a multiply): rows past the array
                # extent are unspecified VMEM and may be NaN/Inf.
                ridx = r + lax.broadcasted_iota(jnp.int32, (CHUNK_ROWS, LANES), 0)
                loss = jnp.where(ridx < tail_rows, loss, 0.0)
            return acc + loss.reshape(CHUNK_ROWS // 8, 8, LANES).sum(axis=0)

        return lax.fori_loop(0, n_chunks, body,
                             jnp.zeros((8, LANES), jnp.float32),
                             unroll=min(8, n_chunks))

    if not (tail_masked or has_dup):
        out_ref[...] += partial_sum(False)
    else:
        n_full = nblocks - 1 if tail_masked else nblocks

        @pl.when(gblock < n_full)
        def _():
            out_ref[...] += partial_sum(False)

        if tail_masked:
            # Only the single block containing the ragged row-tail pays for the mask.
            @pl.when(gblock == nblocks - 1)
            def _():
                out_ref[...] += partial_sum(True)
        # gblock >= nblocks (clamped duplicate of an uneven core split): adds 0.


def _wbce_elementwise_kernel(lg_ref, tg_ref, out_ref, *, pos, neg):
    x = lg_ref[...].astype(jnp.float32)
    t = tg_ref[...].astype(jnp.float32)
    out_ref[...] = _weighted_bce(x, t, pos, neg).astype(out_ref.dtype)


# --------------------------------------------------------------------------- #
# Wrapper
# --------------------------------------------------------------------------- #
def _wbce_none(flat_l, flat_t, pos, neg, numel, orig_shape, ncores, out_dtype):
    if not jnp.issubdtype(out_dtype, jnp.floating):
        out_dtype = jnp.float32

    # 'none' output layout needs a full lane-dense slab -> pad only when ragged.
    padded_len = _round_up(numel, LANES)
    if padded_len != numel:
        flat_l = jnp.pad(flat_l, (0, padded_len - numel))
        flat_t = jnp.pad(flat_t, (0, padded_len - numel))

    l2 = flat_l.reshape(-1, LANES)
    t2 = flat_t.reshape(-1, LANES)
    rows = l2.shape[0]

    sub = max(_sublane_multiple(l2.dtype), _sublane_multiple(t2.dtype),
              _sublane_multiple(out_dtype))
    tile_rows = min(MAX_TILE_ROWS, _round_up(rows, sub))
    nblocks = pl.cdiv(rows, tile_rows)

    if ncores > 1 and nblocks % ncores == 0:
        # v7x: shard blocks across both TensorCores explicitly.
        bpc = nblocks // ncores
        grid = (ncores, bpc)
        imap = lambda c, i: (c * bpc + i, 0)
        dims = (pltpu.CORE_PARALLEL, pltpu.ARBITRARY)
    else:
        grid = (nblocks,)
        imap = lambda i: (i, 0)
        dims = ("arbitrary",)

    kernel = functools.partial(_wbce_elementwise_kernel, pos=float(pos), neg=float(neg))
    in_bytes = l2.size * l2.dtype.itemsize + t2.size * t2.dtype.itemsize
    out_bytes = rows * LANES * jnp.dtype(out_dtype).itemsize

    out = pl.pallas_call(
        kernel,
        out_shape=jax.ShapeDtypeStruct((rows, LANES), out_dtype),
        grid_spec=pltpu.PrefetchScalarGridSpec(
            num_scalar_prefetch=0,
            grid=grid,
            in_specs=[
                pl.BlockSpec((tile_rows, LANES), imap),
                pl.BlockSpec((tile_rows, LANES), imap),
            ],
            out_specs=pl.BlockSpec((tile_rows, LANES), imap),
        ),
        compiler_params=pltpu.CompilerParams(
            dimension_semantics=dims, vmem_limit_bytes=VMEM_LIMIT),
        cost_estimate=pl.CostEstimate(
            flops=12 * numel, transcendentals=3 * numel,
            bytes_accessed=in_bytes + out_bytes),
    )(l2, t2)

    out = out.reshape(-1)
    if padded_len != numel:
        out = out[:numel]
    return out.reshape(orig_shape)


def wbce_loss(logits, targets, pos=1.0, neg=0.1, reduction="mean"):
    """WBCELoss.forward with sigmoid=True, diagonal=False (module defaults)."""
    # TODO(synk): diagonal=True / mask=True (graph self-connection masking) is
    # not implemented; the module default is diagonal=False.
    assert reduction in ("mean", "sum", "none")
    orig_shape = logits.shape
    numel = int(logits.size)
    ncores = _num_tensorcores()

    flat_l = logits.reshape(-1)     # contiguous reshape: free
    flat_t = targets.reshape(-1)

    if reduction == "none":
        return _wbce_none(flat_l, flat_t, pos, neg, numel, orig_shape, ncores,
                          logits.dtype)

    # ---- 'mean' / 'sum': fused streaming reduction over the 128-aligned prefix ----
    rows = numel // LANES
    rem = numel - rows * LANES

    total = jnp.zeros((), jnp.float32)
    if rows > 0:
        aligned = rows * LANES
        pre_l = flat_l if rem == 0 else flat_l[:aligned]
        pre_t = flat_t if rem == 0 else flat_t[:aligned]
        l2 = pre_l.reshape(rows, LANES)
        t2 = pre_t.reshape(rows, LANES)

        tile_rows = min(MAX_TILE_ROWS, _round_up(rows, CHUNK_ROWS))
        nblocks = pl.cdiv(rows, tile_rows)
        blocks_per_core = pl.cdiv(nblocks, ncores)
        has_dup = ncores * blocks_per_core > nblocks
        tail_rows = rows - (nblocks - 1) * tile_rows
        tail_masked = tail_rows < tile_rows

        if has_dup:
            def in_map(c, i):
                # Clamp the (at most one) overflow block of an uneven core split;
                # the kernel gates its contribution to zero.
                return (jnp.minimum(c * blocks_per_core + i, nblocks - 1), 0)
        else:
            def in_map(c, i):
                return (c * blocks_per_core + i, 0)

        dims = ((pltpu.CORE_PARALLEL, pltpu.ARBITRARY) if ncores > 1
                else ("arbitrary", "arbitrary"))

        kernel = functools.partial(
            _wbce_reduce_kernel, pos=float(pos), neg=float(neg),
            nblocks=nblocks, blocks_per_core=blocks_per_core,
            tail_rows=tail_rows, tail_masked=tail_masked, has_dup=has_dup)

        in_bytes = l2.size * l2.dtype.itemsize + t2.size * t2.dtype.itemsize
        partial_slab = pl.pallas_call(
            kernel,
            out_shape=jax.ShapeDtypeStruct((ncores * 8, LANES), jnp.float32),
            grid_spec=pltpu.PrefetchScalarGridSpec(
                num_scalar_prefetch=0,
                grid=(ncores, blocks_per_core),
                in_specs=[
                    pl.BlockSpec((tile_rows, LANES), in_map),
                    pl.BlockSpec((tile_rows, LANES), in_map),
                ],
                out_specs=pl.BlockSpec((8, LANES), lambda c, i: (c, 0)),
            ),
            compiler_params=pltpu.CompilerParams(
                dimension_semantics=dims, vmem_limit_bytes=VMEM_LIMIT),
            cost_estimate=pl.CostEstimate(
                flops=12 * rows * LANES,
                transcendentals=3 * rows * LANES,
                bytes_accessed=in_bytes + ncores * 8 * LANES * 4),
        )(l2, t2)
        total = jnp.sum(partial_slab)

    if rem:
        # <128-element ragged remainder: one tiny XLA reduction, no full-tensor pad copy.
        rem_l = flat_l[rows * LANES:].astype(jnp.float32)
        rem_t = flat_t[rows * LANES:].astype(jnp.float32)
        total = total + jnp.sum(_weighted_bce(rem_l, rem_t, float(pos), float(neg)))

    if reduction == "mean":
        return total / jnp.float32(numel)
    return total


# --------------------------------------------------------------------------- #
# Reference + self-test
# --------------------------------------------------------------------------- #
def _wbce_reference_elem(logits, targets, pos=1.0, neg=0.1):
    # Mirrors the PyTorch module (sigmoid + eps-in-log form).
    p = jax.nn.sigmoid(logits.astype(jnp.float32))
    t = targets.astype(jnp.float32)
    return -(pos * t * jnp.log(p + 1e-8) + neg * (1.0 - t) * jnp.log(1.0 - p + 1e-8))


if __name__ == "__main__":
    key = jax.random.PRNGKey(0)
    k1, k2, k3, k4 = jax.random.split(key, 4)

    # NCHW, same convention as the PyTorch module: [Batch, Channels, H, W]
    logits = jax.random.normal(k1, (2, 4, 16, 16), dtype=jnp.float32)
    targets = (jax.random.uniform(k2, (2, 4, 16, 16)) > 0.7).astype(jnp.float32)

    loss_mean = jax.block_until_ready(wbce_loss(logits, targets, reduction="mean"))
    loss_sum = jax.block_until_ready(wbce_loss(logits, targets, reduction="sum"))
    loss_none = jax.block_until_ready(wbce_loss(logits, targets, reduction="none"))

    ref = _wbce_reference_elem(logits, targets)
    assert jnp.allclose(loss_mean, jnp.mean(ref), rtol=1e-4, atol=1e-5), (loss_mean, jnp.mean(ref))
    assert jnp.allclose(loss_sum, jnp.sum(ref), rtol=1e-4, atol=1e-3), (loss_sum, jnp.sum(ref))
    assert jnp.allclose(loss_none, ref, rtol=1e-4, atol=1e-5), "elementwise mismatch"

    # Ragged numel (not a multiple of 128): exercises prefix + XLA remainder fold.
    logits_r = jax.random.normal(k3, (3, 5, 47), dtype=jnp.float32)
    targets_r = (jax.random.uniform(k4, (3, 5, 47)) > 0.7).astype(jnp.float32)

    r_mean = jax.block_until_ready(wbce_loss(logits_r, targets_r, reduction="mean"))
    r_sum = jax.block_until_ready(wbce_loss(logits_r, targets_r, reduction="sum"))
    r_none = jax.block_until_ready(wbce_loss(logits_r, targets_r, reduction="none"))

    ref_r = _wbce_reference_elem(logits_r, targets_r)
    assert jnp.allclose(r_mean, jnp.mean(ref_r), rtol=1e-4, atol=1e-5), (r_mean, jnp.mean(ref_r))
    assert jnp.allclose(r_sum, jnp.sum(ref_r), rtol=1e-4, atol=1e-3), (r_sum, jnp.sum(ref_r))
    assert jnp.allclose(r_none, ref_r, rtol=1e-4, atol=1e-5), "ragged elementwise mismatch"

    print("KERNEL_OK")
</pallas_src>

<mosaic_0001>
module attributes {stable_mosaic.version = 11 : i64} {
  func.func @_wbce_reduce_kernel(%arg0: i32, %arg1: i32, %arg2: memref<64x128xf32, #tpu.memory_space<vmem>>, %arg3: memref<64x128xf32, #tpu.memory_space<vmem>>, %arg4: memref<8x128xf32, #tpu.memory_space<vmem>>) attributes {dimension_semantics = [#tpu.dimension_semantics<arbitrary>, #tpu.dimension_semantics<arbitrary>], iteration_bounds = array<i64: 1, 1>, scalar_prefetch = 0 : i64, scratch_operands = 0 : i64, tpu.core_type = #tpu.core_type<tc>, window_params = [{transform_indices = @transform_0, window_bounds = array<i64: 64, 128>}, {transform_indices = @transform_1, window_bounds = array<i64: 64, 128>}, {transform_indices = @transform_2, window_bounds = array<i64: 8, 128>}]} {
    %c1_i32 = arith.constant 1 : i32
    %0 = arith.muli %arg0, %c1_i32 : i32
    %1 = arith.addi %0, %arg1 : i32
    %c0_i32 = arith.constant 0 : i32
    %2 = arith.cmpi eq, %arg1, %c0_i32 : i32
    %3 = arith.extui %2 : i1 to i32
    %c0_i32_0 = arith.constant 0 : i32
    %4 = arith.cmpi ne, %3, %c0_i32_0 : i32
    scf.if %4 {
      %cst = arith.constant 0.000000e+00 : f32
      %11 = vector.broadcast %cst : f32 to vector<8x128xf32>
      %c0 = arith.constant 0 : index
      %c0_5 = arith.constant 0 : index
      %12 = vector.load %arg4[%c0, %c0_5] : memref<8x128xf32, #tpu.memory_space<vmem>>, vector<8x128xf32>
      tpu.vector_store %arg4[%c0, %c0_5], %11 {strides = array<i32>} : memref<8x128xf32, #tpu.memory_space<vmem>>, vector<8x128xf32>,
    } else {
    }
    %c0_i32_1 = arith.constant 0 : i32
    %5 = arith.cmpi slt, %1, %c0_i32_1 : i32
    %6 = arith.extui %5 : i1 to i32
    %c0_i32_2 = arith.constant 0 : i32
    %7 = arith.cmpi ne, %6, %c0_i32_2 : i32
    scf.if %7 {
      %c0 = arith.constant 0 : index
      %c0_5 = arith.constant 0 : index
      %11 = vector.load %arg4[%c0, %c0_5] : memref<8x128xf32, #tpu.memory_space<vmem>>, vector<8x128xf32>
      %cst = arith.constant 0.000000e+00 : f32
      %12 = vector.broadcast %cst : f32 to vector<8x128xf32>
      %c0_i32_6 = arith.constant 0 : i32
      %c64_i32 = arith.constant 64 : i32
      %13 = arith.muli %c0_i32_6, %c64_i32 : i32
      %14 = tpu.assume_multiple %13, 64 : i32
      %15 = arith.index_cast %14 : i32 to index
      %c0_7 = arith.constant 0 : index
      %16 = vector.load %arg2[%15, %c0_7] : memref<64x128xf32, #tpu.memory_space<vmem>>, vector<64x128xf32>
      %17 = arith.index_cast %14 : i32 to index
      %c0_8 = arith.constant 0 : index
      %18 = vector.load %arg3[%17, %c0_8] : memref<64x128xf32, #tpu.memory_space<vmem>>, vector<64x128xf32>
      %19 = math.absf %16 : vector<64x128xf32>
      %cst_9 = arith.constant 0.000000e+00 : f32
      %20 = vector.broadcast %cst_9 : f32 to vector<64x128xf32>
      %21 = arith.subf %20, %19 : vector<64x128xf32>
      %22 = math.exp %21 : vector<64x128xf32>
      %cst_10 = arith.constant 0.000000e+00 : f32
      %23 = vector.broadcast %cst_10 : f32 to vector<64x128xf32>
      %24 = arith.cmpf oge, %16, %23 : vector<64x128xf32>
      %cst_11 = arith.constant 1.000000e+00 : f32
      %25 = vector.broadcast %cst_11 : f32 to vector<64x128xf32>
      %26 = arith.select %24, %25, %22 : vector<64x128xi1>, vector<64x128xf32>
      %cst_12 = arith.constant 1.000000e+00 : f32
      %27 = vector.broadcast %cst_12 : f32 to vector<64x128xf32>
      %28 = arith.addf %27, %22 : vector<64x128xf32>
      %29 = arith.divf %26, %28 : vector<64x128xf32>
      %cst_13 = arith.constant 1.000000e+00 : f32
      %30 = vector.broadcast %cst_13 : f32 to vector<64x128xf32>
      %31 = arith.mulf %30, %18 : vector<64x128xf32>
      %cst_14 = arith.constant 9.99999993E-9 : f32
      %32 = vector.broadcast %cst_14 : f32 to vector<64x128xf32>
      %33 = arith.addf %29, %32 : vector<64x128xf32>
      %34 = math.log %33 : vector<64x128xf32>
      %35 = arith.mulf %31, %34 : vector<64x128xf32>
      %cst_15 = arith.constant 1.000000e+00 : f32
      %36 = vector.broadcast %cst_15 : f32 to vector<64x128xf32>
      %37 = arith.subf %36, %18 : vector<64x128xf32>
      %cst_16 = arith.constant 1.000000e-01 : f32
      %38 = vector.broadcast %cst_16 : f32 to vector<64x128xf32>
      %39 = arith.mulf %38, %37 : vector<64x128xf32>
      %cst_17 = arith.constant 1.000000e+00 : f32
      %40 = vector.broadcast %cst_17 : f32 to vector<64x128xf32>
      %41 = arith.subf %40, %29 : vector<64x128xf32>
      %cst_18 = arith.constant 9.99999993E-9 : f32
      %42 = vector.broadcast %cst_18 : f32 to vector<64x128xf32>
      %43 = arith.addf %41, %42 : vector<64x128xf32>
      %44 = math.log %43 : vector<64x128xf32>
      %45 = arith.mulf %39, %44 : vector<64x128xf32>
      %46 = arith.addf %35, %45 : vector<64x128xf32>
      %cst_19 = arith.constant 0.000000e+00 : f32
      %47 = vector.broadcast %cst_19 : f32 to vector<64x128xf32>
      %48 = arith.subf %47, %46 : vector<64x128xf32>
      %49 = vector.shape_cast %48 : vector<64x128xf32> to vector<8x8x128xf32>
      %cst_20 = arith.constant dense<0.000000e+00> : vector<8x128xf32>
      %50 = vector.multi_reduction <add>, %49, %cst_20 [0] : vector<8x8x128xf32> to vector<8x128xf32>
      %51 = arith.addf %12, %50 : vector<8x128xf32>
      %c1_i32_21 = arith.constant 1 : i32
      %52 = arith.addf %11, %51 : vector<8x128xf32>
      %c0_22 = arith.constant 0 : index
      %c0_23 = arith.constant 0 : index
      %53 = vector.load %arg4[%c0_22, %c0_23] : memref<8x128xf32, #tpu.memory_space<vmem>>, vector<8x128xf32>
      tpu.vector_store %arg4[%c0_22, %c0_23], %52 {strides = array<i32>} : memref<8x128xf32, #tpu.memory_space<vmem>>, vector<8x128xf32>,
    } else {
    }
    %c0_i32_3 = arith.constant 0 : i32
    %8 = arith.cmpi eq, %1, %c0_i32_3 : i32
    %9 = arith.extui %8 : i1 to i32
    %c0_i32_4 = arith.constant 0 : i32
    %10 = arith.cmpi ne, %9, %c0_i32_4 : i32
    scf.if %10 {
      %c0 = arith.constant 0 : index
      %c0_5 = arith.constant 0 : index
      %11 = vector.load %arg4[%c0, %c0_5] : memref<8x128xf32, #tpu.memory_space<vmem>>, vector<8x128xf32>
      %cst = arith.constant 0.000000e+00 : f32
      %12 = vector.broadcast %cst : f32 to vector<8x128xf32>
      %c0_i32_6 = arith.constant 0 : i32
      %c64_i32 = arith.constant 64 : i32
      %13 = arith.muli %c0_i32_6, %c64_i32 : i32
      %14 = tpu.assume_multiple %13, 64 : i32
      %15 = arith.index_cast %14 : i32 to index
      %c0_7 = arith.constant 0 : index
      %16 = vector.load %arg2[%15, %c0_7] : memref<64x128xf32, #tpu.memory_space<vmem>>, vector<64x128xf32>
      %17 = arith.index_cast %14 : i32 to index
      %c0_8 = arith.constant 0 : index
      %18 = vector.load %arg3[%17, %c0_8] : memref<64x128xf32, #tpu.memory_space<vmem>>, vector<64x128xf32>
      %19 = math.absf %16 : vector<64x128xf32>
      %cst_9 = arith.constant 0.000000e+00 : f32
      %20 = vector.broadcast %cst_9 : f32 to vector<64x128xf32>
      %21 = arith.subf %20, %19 : vector<64x128xf32>
      %22 = math.exp %21 : vector<64x128xf32>
      %cst_10 = arith.constant 0.000000e+00 : f32
      %23 = vector.broadcast %cst_10 : f32 to vector<64x128xf32>
      %24 = arith.cmpf oge, %16, %23 : vector<64x128xf32>
      %cst_11 = arith.constant 1.000000e+00 : f32
      %25 = vector.broadcast %cst_11 : f32 to vector<64x128xf32>
      %26 = arith.select %24, %25, %22 : vector<64x128xi1>, vector<64x128xf32>
      %cst_12 = arith.constant 1.000000e+00 : f32
      %27 = vector.broadcast %cst_12 : f32 to vector<64x128xf32>
      %28 = arith.addf %27, %22 : vector<64x128xf32>
      %29 = arith.divf %26, %28 : vector<64x128xf32>
      %cst_13 = arith.constant 1.000000e+00 : f32
      %30 = vector.broadcast %cst_13 : f32 to vector<64x128xf32>
      %31 = arith.mulf %30, %18 : vector<64x128xf32>
      %cst_14 = arith.constant 9.99999993E-9 : f32
      %32 = vector.broadcast %cst_14 : f32 to vector<64x128xf32>
      %33 = arith.addf %29, %32 : vector<64x128xf32>
      %34 = math.log %33 : vector<64x128xf32>
      %35 = arith.mulf %31, %34 : vector<64x128xf32>
      %cst_15 = arith.constant 1.000000e+00 : f32
      %36 = vector.broadcast %cst_15 : f32 to vector<64x128xf32>
      %37 = arith.subf %36, %18 : vector<64x128xf32>
      %cst_16 = arith.constant 1.000000e-01 : f32
      %38 = vector.broadcast %cst_16 : f32 to vector<64x128xf32>
      %39 = arith.mulf %38, %37 : vector<64x128xf32>
      %cst_17 = arith.constant 1.000000e+00 : f32
      %40 = vector.broadcast %cst_17 : f32 to vector<64x128xf32>
      %41 = arith.subf %40, %29 : vector<64x128xf32>
      %cst_18 = arith.constant 9.99999993E-9 : f32
      %42 = vector.broadcast %cst_18 : f32 to vector<64x128xf32>
      %43 = arith.addf %41, %42 : vector<64x128xf32>
      %44 = math.log %43 : vector<64x128xf32>
      %45 = arith.mulf %39, %44 : vector<64x128xf32>
      %46 = arith.addf %35, %45 : vector<64x128xf32>
      %cst_19 = arith.constant 0.000000e+00 : f32
      %47 = vector.broadcast %cst_19 : f32 to vector<64x128xf32>
      %48 = arith.subf %47, %46 : vector<64x128xf32>
      %49 = tpu.iota {dimensions = array<i32: 0>} : vector<64x128xi32>
      %50 = vector.broadcast %14 : i32 to vector<64x128xi32>
      %51 = arith.addi %50, %49 : vector<64x128xi32>
      %c16_i32 = arith.constant 16 : i32
      %52 = vector.broadcast %c16_i32 : i32 to vector<64x128xi32>
      %53 = arith.cmpi slt, %51, %52 : vector<64x128xi32>
      %cst_20 = arith.constant 0.000000e+00 : f32
      %54 = vector.broadcast %cst_20 : f32 to vector<64x128xf32>
      %55 = arith.select %53, %48, %54 : vector<64x128xi1>, vector<64x128xf32>
      %56 = vector.shape_cast %55 : vector<64x128xf32> to vector<8x8x128xf32>
      %cst_21 = arith.constant dense<0.000000e+00> : vector<8x128xf32>
      %57 = vector.multi_reduction <add>, %56, %cst_21 [0] : vector<8x8x128xf32> to vector<8x128xf32>
      %58 = arith.addf %12, %57 : vector<8x128xf32>
      %c1_i32_22 = arith.constant 1 : i32
      %59 = arith.addf %11, %58 : vector<8x128xf32>
      %c0_23 = arith.constant 0 : index
      %c0_24 = arith.constant 0 : index
      %60 = vector.load %arg4[%c0_23, %c0_24] : memref<8x128xf32, #tpu.memory_space<vmem>>, vector<8x128xf32>
      tpu.vector_store %arg4[%c0_23, %c0_24], %59 {strides = array<i32>} : memref<8x128xf32, #tpu.memory_space<vmem>>, vector<8x128xf32>,
    } else {
    }
    return
  }
  func.func @transform_0(%arg0: i32, %arg1: i32) -> (i32, i32) {
    %c1_i32 = arith.constant 1 : i32
    %0 = arith.muli %arg0, %c1_i32 : i32
    %1 = arith.addi %0, %arg1 : i32
    %c0_i32 = arith.constant 0 : i32
    %c0_i32_0 = arith.constant 0 : i32
    return %1, %c0_i32 : i32, i32
  }
  func.func @transform_1(%arg0: i32, %arg1: i32) -> (i32, i32) {
    %c1_i32 = arith.constant 1 : i32
    %0 = arith.muli %arg0, %c1_i32 : i32
    %1 = arith.addi %0, %arg1 : i32
    %c0_i32 = arith.constant 0 : i32
    %c0_i32_0 = arith.constant 0 : i32
    return %1, %c0_i32 : i32, i32
  }
  func.func @transform_2(%arg0: i32, %arg1: i32) -> (i32, i32) {
    %c0_i32 = arith.constant 0 : i32
    %c0_i32_0 = arith.constant 0 : i32
    return %arg0, %c0_i32 : i32, i32
  }
}

</mosaic_0001>

<bundles_post_ra>
// kernel: tpu_custom_call.1
= control target key start
LH: loop header
LB: loop body
LE: loop exit
PB: predicated region body
PF: predicated region fallthrough
CT: control target
= control target key end

     0   :  { %7 = vsyncpa [#allocation3], 0  ;;  %s651_s0 = inlined_call_operand.hbm [shape: f32[16,128], index: 0, kind: input, shape index: {}]   ;;  %s652_s1 = inlined_call_operand.hbm [shape: f32[16,128], index: 1, kind: input, shape index: {}]   ;;  %s653_s2 = inlined_call_operand.hbm [shape: f32[8,128], index: 2, kind: output, shape index: {}]  }
   0x1   :  { %8 = vsyncpa [#allocation6], 0 }
   0x2   :  { %9 = vsyncpa [#allocation4], 0 }
   0x3   :  { %18 = vsyncadd [#allocation3], 768  ;;  %s622_s9 = smov [#allocation2]  }
   0x4   :  { %s23_s10 = sshll.u32 %s622_s9, 4  ;;  %s24_s10 = int_to_ptr.vmem [resolvable:$true] %s23_s10 }
   0x5   :  { %s564_s11 = scalar_lea.vmem %s24_s10, 256  ;;  %s568_s12 = scalar_lea.vmem %s24_s10, 1024 }
   0x6   :  { %p565_p0 = scmp.ne.s32.totalorder %s24_s10, %s564_s11  ;;  %p569_p1 = scmp.lt.s32.totalorder %s24_s10, %s24_s10 }
   0x7   :  { %p570_p2 = scmp.lt.s32.totalorder %s568_s12, %s564_s11 }
   0x9   :  { %p571_p3 = por %p570_p2, %p569_p1 }
   0xb   :  { %p572_p4 = pnand %p571_p3, %p565_p0 }
   0xd   :  { %575 = shalt.err (!%p572_p4)
}
   0xe   :  { %s623_s13 = smov 128   ;;  %s624_s14 = smov 8  }
   0xf   :  { %29 = dma.hbm_to_vmem [thread:$0]  %s651_s0, 256, %s24_s10, [#allocation3], %s623_s13, %s623_s13, %s624_s14  }
  0x10   :  { %38 = vsyncadd [#allocation6], 768  ;;  %s625_s17 = smov [#allocation5]  }
  0x11   :  { %s43_s18 = sshll.u32 %s625_s17, 4  ;;  %s44_s18 = int_to_ptr.vmem [resolvable:$true] %s43_s18 }
  0x12   :  { %s584_s19 = scalar_lea.vmem %s44_s18, 256  ;;  %s588_s20 = scalar_lea.vmem %s44_s18, 1024 }
  0x13   :  { %p585_p5 = scmp.ne.s32.totalorder %s44_s18, %s584_s19  ;;  %p589_p6 = scmp.lt.s32.totalorder %s44_s18, %s44_s18 }
  0x14   :  { %p590_p7 = scmp.lt.s32.totalorder %s588_s20, %s584_s19 }
  0x16   :  { %p591_p8 = por %p590_p7, %p589_p6 }
  0x18   :  { %p592_p9 = pnand %p591_p8, %p585_p5 }
  0x1a   :  { %595 = shalt.err (!%p592_p9)
}
  0x1b   :  { %49 = dma.hbm_to_vmem [thread:$0]  %s652_s1, 256, %s44_s18, [#allocation6], %s623_s13, %s623_s13, %s624_s14  }
  0x1c   :  { %616 = dma.done.wait [#allocation3], 1024  }
  0x1d   :  { %617 = vsyncadd [#allocation3], 4294966272 }
  0x1e   :  { %618 = dma.done.wait [#allocation6], 1024  }
  0x1f   :  { %619 = vsyncadd [#allocation6], 4294966272  ;;  %v282_v0 = vld [vmem:[#allocation2] sm:$0xff]  ;;  %v283_v1 = vld [vmem:[#allocation2 + $0x8] sm:$0xff]  ;;  %s626_s0 = smov [#allocation7]  }
  0x20   :  { %v298_v2 = vand.u32 2147483647, %v282_v0  ;;  %v299_v3 = vand.u32 2147483647, %v283_v1  ;;  %vm330_vm0 = vcmp.ge.f32.partialorder %v282_v0, 0.0  ;;  %vm331_vm1 = vcmp.ge.f32.partialorder %v283_v1, 0.0 }
  0x21   :  { %v290_v24 = vld [vmem:[#allocation5] sm:$0xff]  ;;  %v291_v25 = vld [vmem:[#allocation5 + $0x8] sm:$0xff]  ;;  %s524_s1 = sshll.u32 %s626_s0, 4  ;;  %s525_s1 = int_to_ptr.vmem [resolvable:$true] %s524_s1 }
  0x22   :  { %v306_v4 = vsub.f32 0.0, %v298_v2  ;;  %v307_v5 = vsub.f32 0.0, %v299_v3  ;;  %v402_v26 = vsub.f32 1.0, %v290_v24  ;;  %v403_v27 = vsub.f32 1.0, %v291_v25  ;;  %s596_s23 = scalar_lea.vmem %s525_s1, 128  ;;  %p601_p11 = scmp.lt.s32.totalorder %s525_s1, %s525_s1 }
  0x23   :  { %p597_p10 = scmp.ne.s32.totalorder %s525_s1, %s596_s23  ;;  %p602_p12 = scmp.lt.s32.totalorder %s596_s23, %s596_s23 }
  0x24   :  { %v314_v6 = vmul.f32 1.442695, %v306_v4  ;;  %v316_v7 = vmul.f32 1.442695, %v307_v5  ;;  %v410_v31 = vmul.f32 0.1, %v402_v26 }
  0x25   :  { %v411_v34 = vmul.f32 0.1, %v403_v27  ;;  %p603_p13 = por %p602_p12, %p601_p11 }
  0x26   :  { %540 = vpow2.f32 %v314_v6 }
  0x27   :  { %542 = vpow2.f32 %v316_v7  ;;  %p604_p0 = pnand %p603_p13, %p597_p10 }
  0x33   :  { %v541_v8 = vpop.eup %540 }
  0x34   :  { %v543_v9 = vpop.eup %542  ;;  %v346_v10 = vadd.f32 1.0, %v541_v8  ;;  %v338_v12 = vsel %vm330_vm0, 1.0, %v541_v8 }
  0x35   :  { %v347_v11 = vadd.f32 1.0, %v543_v9  ;;  %v339_v13 = vsel %vm331_vm1, 1.0, %v543_v9 }
  0x36   :  { %544 = vrcp.f32 %v346_v10 }
  0x37   :  { %546 = vrcp.f32 %v347_v11 }
  0x43   :  { %v545_v14 = vpop.eup %544 }
  0x44   :  { %v547_v15 = vpop.eup %546  ;;  %v355_v16 = vmul.f32 %v545_v14, %v338_v12 }
  0x45   :  { %v357_v17 = vmul.f32 %v547_v15, %v339_v13 }
  0x46   :  { %v370_v18 = vadd.f32 1e-08, %v355_v16  ;;  %v418_v19 = vsub.f32 1.0, %v355_v16 }
  0x47   :  { %v371_v20 = vadd.f32 1e-08, %v357_v17  ;;  %v419_v21 = vsub.f32 1.0, %v357_v17 }
  0x48   :  { %548 = vlog2.f32 %v370_v18  ;;  %v426_v22 = vadd.f32 1e-08, %v418_v19 }
  0x49   :  { %550 = vlog2.f32 %v371_v20  ;;  %v427_v23 = vadd.f32 1e-08, %v419_v21 }
  0x4a   :  { %552 = vlog2.f32 %v426_v22 }
  0x4b   :  { %554 = vlog2.f32 %v427_v23 }
  0x55   :  { %v549_v28 = vpop.eup %548 }
  0x56   :  { %v551_v29 = vpop.eup %550  ;;  %v379_v30 = vmul.f32 0.6931472, %v549_v28 }
  0x57   :  { %v553_v32 = vpop.eup %552  ;;  %v381_v33 = vmul.f32 0.6931472, %v551_v29 }
  0x58   :  { %v555_v35 = vpop.eup %554  ;;  %v394_v36 = vmul.f32 %v379_v30, %v290_v24  ;;  %v435_v37 = vmul.f32 0.6931472, %v553_v32 }
  0x59   :  { %v395_v38 = vmul.f32 %v381_v33, %v291_v25  ;;  %v437_v39 = vmul.f32 0.6931472, %v555_v35 }
  0x5a   :  { %v450_v40 = vmul.f32 %v435_v37, %v410_v31 }
  0x5b   :  { %v451_v41 = vmul.f32 %v437_v39, %v411_v34 }
  0x5c   :  { %v458_v42 = vadd.f32 %v450_v40, %v394_v36 }
  0x5d   :  { %v459_v43 = vadd.f32 %v451_v41, %v395_v38 }
  0x5e   :  { %v466_v44 = vsub.f32 0.0, %v458_v42 }
  0x5f   :  { %v467_v45 = vsub.f32 0.0, %v459_v43 }
  0x61   :  { %v508_v46 = vadd.f32 %v467_v45, %v466_v44 }
  0x63   :  { %517 = vst [vmem:[#allocation7] sm:$0xff] %v508_v46 }
  0x64   :  { %607 = shalt.err (!%p604_p0)
}
  0x65   :  { %527 = dma.vmem_to_hbm [thread:$0]  %s525_s1, 128, %s653_s2, [#allocation4]  }
  0x66   :  { %620 = dma.done.wait [#allocation4], 128  }
  0x67   :  { %621 = vsyncadd [#allocation4], 4294967168 }
  0x68   :  { %531 = vsyncpa [#allocation3], 1 }
  0x69   :  { %532 = vsyncpa [#allocation6], 1 }
  0x6a   :  { %533 = vsyncpa [#allocation4], 1 }

</bundles_post_ra>
